<compile_context>
chip_gen: v7x
topology: tpu7x:2x2x1
jax: 0.10.0
libtpu: 0.0.40
codegen_flags: <defaults>
</compile_context>

<pallas_src>
import jax
import jax.numpy as jnp
from jax.experimental import pallas as pl
from jax.experimental.pallas import tpu as pltpu


def rcab_kernel(x_ref, w1_ref, b1_ref, w2_ref, b2_ref,
                caw1t_ref, cab1c_ref, caw2_ref, cab2_ref,
                out_ref, pad_ref):
    # x_ref    : (1, H, W*C)     lane-dense input slab (also the residual)
    # w*_ref   : (KH, W*C, W*C)  block-banded conv weights (W taps folded in)
    # b*_ref   : (1, W*C)        conv bias, tiled W times along lanes
    # caw1t_ref: (Cr, C), cab1c_ref: (Cr, 1)  CA squeeze (pre-transposed)
    # caw2_ref : (Cr, C), cab2_ref : (1, C)   CA excite
    # pad_ref  : VMEM scratch (H + 2P, W*C) for H zero-padding (shared by both convs)
    H, WC = x_ref.shape[1], x_ref.shape[2]
    KH = w1_ref.shape[0]
    P = KH // 2
    C = caw2_ref.shape[1]
    W = WC // C
    inv_hw = 1.0 / float(H * W)

    x = x_ref[0]                                   # (H, WC) f32

    # Zero the pad scratch once per grid step; the interior is overwritten by
    # each conv below, border rows stay zero (this is the H zero-padding).
    pad_ref[...] = jnp.zeros_like(pad_ref)

    def conv(src, bw_ref, bias_ref):
        pad_ref[pl.ds(P, H), :] = src              # lane-aligned interior store
        out = None
        for dh in range(KH):                       # 3 MXU matmuls, K = W*C
            d = jnp.dot(pad_ref[pl.ds(dh, H), :], bw_ref[dh],
                        preferred_element_type=jnp.float32)
            out = d if out is None else out + d
        return out + bias_ref[...]

    # conv1 + ReLU, then conv2 (no activation)
    h1 = jnp.maximum(conv(x, w1_ref, b1_ref), 0.0)       # (H, WC)
    h2 = conv(h1, w2_ref, b2_ref)                        # (H, WC)

    # ---- CALayer: global avg pool -> 1x1 -> ReLU -> 1x1 -> sigmoid -> scale ----
    s = jnp.sum(h2, axis=0, keepdims=True)               # (1, WC) sublane sum
    y = s[:, 0:C]
    for w in range(1, W):                                # fold the W lane groups
        y = y + s[:, w * C:(w + 1) * C]
    y = y * inv_hw                                       # (1, C) channel means

    # squeeze: z1[j] = relu(sum_c y[c] * W1[c, j] + b1[j])   (VPU, not M=1 MXU)
    z1 = jnp.maximum(
        jnp.sum(y * caw1t_ref[...], axis=1, keepdims=True) + cab1c_ref[...],
        0.0)                                             # (Cr, 1)
    # excite: z2[co] = sigmoid(sum_j z1[j] * W2[j, co] + b2[co])
    z2 = jax.nn.sigmoid(
        jnp.sum(z1 * caw2_ref[...], axis=0, keepdims=True) + cab2_ref[...])  # (1, C)

    scale = jnp.concatenate([z2] * W, axis=1)            # (1, WC) per-channel scale
    out_ref[0] = (h2 * scale + x).astype(out_ref.dtype)  # rescale + residual


def band_conv_weights(w_hwio, out_w):
    """Fold the KW taps (and the W zero-padding) of an HWIO conv weight into
    block-banded matrices: returns (KH, W*C, W*C) with
    B[dh, wi*C+ci, wo*C+co] = w[dh, wi-wo+P, ci, co] if |wi-wo| <= P else 0."""
    KH, KW, cin, cout = w_hwio.shape
    assert cin == cout
    C = cin
    P = KW // 2
    wc = out_w * C
    wi = jnp.arange(wc) // C
    ci = jnp.arange(wc) % C
    wo = jnp.arange(wc) // C
    co = jnp.arange(wc) % C
    dw = wi[:, None] - wo[None, :] + P                    # (wc, wc)
    valid = (dw >= 0) & (dw < KW)
    dw_c = jnp.clip(dw, 0, KW - 1)
    g = w_hwio[:, dw_c, ci[:, None], co[None, :]]         # (KH, wc, wc)
    return jnp.where(valid[None, :, :], g, 0.0).astype(jnp.float32)


def rcab_forward_nhwc(x, params, kernel_size=3):
    """x: (N, H, W, C) float32. Returns (N, H, W, C)."""
    w1, b1, w2, b2, caw1, cab1, caw2, cab2 = params
    N, H, W, C = x.shape
    Cr = caw1.shape[1]
    WC = W * C
    KH = kernel_size
    P = KH // 2

    # Host-side (one-time) weight re-arrangement; data reshape is free (contiguous).
    x_d = x.reshape(N, H, WC)
    bw1 = band_conv_weights(w1, W)                        # (KH, WC, WC)
    bw2 = band_conv_weights(w2, W)
    b1t = jnp.tile(b1, (1, W))                            # (1, WC)
    b2t = jnp.tile(b2, (1, W))
    caw1t = caw1.T                                        # (Cr, C)
    cab1c = cab1.reshape(Cr, 1)                           # (Cr, 1)

    full = lambda shape: pl.BlockSpec(shape, lambda i: (0,) * len(shape))

    out_d = pl.pallas_call(
        rcab_kernel,
        out_shape=jax.ShapeDtypeStruct((N, H, WC), x.dtype),
        grid=(N,),
        in_specs=[
            pl.BlockSpec((1, H, WC), lambda i: (i, 0, 0)),   # x (dense slab)
            full((KH, WC, WC)),                              # banded conv1 weight
            full((1, WC)),                                   # tiled bias 1
            full((KH, WC, WC)),                              # banded conv2 weight
            full((1, WC)),                                   # tiled bias 2
            full((Cr, C)),                                   # caw1^T
            full((Cr, 1)),                                   # cab1 (column)
            full((Cr, C)),                                   # caw2
            full((1, C)),                                    # cab2
        ],
        out_specs=pl.BlockSpec((1, H, WC), lambda i: (i, 0, 0)),
        scratch_shapes=[pltpu.VMEM((H + 2 * P, WC), jnp.float32)],
        compiler_params=pltpu.CompilerParams(
            dimension_semantics=("parallel",)),
    )(x_d, bw1, b1t, bw2, b2t, caw1t, cab1c, caw2, cab2)

    return out_d.reshape(N, H, W, C)


def rcab_reference_nhwc(x, params, kernel_size=3):
    """Pure-JAX reference (mirrors the PyTorch forward) for validation."""
    w1, b1, w2, b2, caw1, cab1, caw2, cab2 = params
    P = kernel_size // 2
    dn = ("NHWC", "HWIO", "NHWC")
    h1 = jax.lax.conv_general_dilated(
        x, w1, (1, 1), [(P, P), (P, P)], dimension_numbers=dn) + b1
    h1 = jnp.maximum(h1, 0.0)
    h2 = jax.lax.conv_general_dilated(
        h1, w2, (1, 1), [(P, P), (P, P)], dimension_numbers=dn) + b2
    y = jnp.mean(h2, axis=(1, 2), keepdims=True)                  # (N,1,1,C)
    y = jnp.maximum(jnp.einsum("nabc,cd->nabd", y, caw1) + cab1, 0.0)
    y = jax.nn.sigmoid(jnp.einsum("nabc,cd->nabd", y, caw2) + cab2)
    return h2 * y + x


def make_params(key, n_feat, reduction, kernel_size=3):
    cr = n_feat // reduction
    ks = jax.random.split(key, 8)
    scale = 0.1
    w1 = scale * jax.random.normal(ks[0], (kernel_size, kernel_size, n_feat, n_feat), jnp.float32)
    b1 = scale * jax.random.normal(ks[1], (1, n_feat), jnp.float32)
    w2 = scale * jax.random.normal(ks[2], (kernel_size, kernel_size, n_feat, n_feat), jnp.float32)
    b2 = scale * jax.random.normal(ks[3], (1, n_feat), jnp.float32)
    caw1 = scale * jax.random.normal(ks[4], (n_feat, cr), jnp.float32)
    cab1 = scale * jax.random.normal(ks[5], (1, cr), jnp.float32)
    caw2 = scale * jax.random.normal(ks[6], (cr, n_feat), jnp.float32)
    cab2 = scale * jax.random.normal(ks[7], (1, n_feat), jnp.float32)
    return (w1, b1, w2, b2, caw1, cab1, caw2, cab2)


if __name__ == "__main__":
    # RCAB(conv=default_conv, n_feat=8, kernel_size=3, reduction=4)
    N, H, W, C = 2, 16, 16, 8
    reduction = 4
    kernel_size = 3

    key = jax.random.PRNGKey(0)
    kx, kp = jax.random.split(key)
    # NCHW input (PyTorch convention) -> NHWC for the kernel.
    x_nchw = jax.random.normal(kx, (N, C, H, W), jnp.float32)
    x = jnp.transpose(x_nchw, (0, 2, 3, 1))                     # NHWC

    params = make_params(kp, C, reduction, kernel_size)

    out = rcab_forward_nhwc(x, params, kernel_size)
    out = jax.block_until_ready(out)

    ref = rcab_reference_nhwc(x, params, kernel_size)
    assert out.shape == (N, H, W, C)
    assert jnp.allclose(out, ref, atol=1e-4, rtol=1e-4)

    print("KERNEL_OK")
</pallas_src>

<mosaic_0001>
module attributes {stable_mosaic.version = 11 : i64} {
  func.func @rcab_kernel(%arg0: i32, %arg1: memref<1x16x128xf32, #tpu.memory_space<vmem>>, %arg2: memref<3x128x128xf32, #tpu.memory_space<vmem>>, %arg3: memref<1x128xf32, #tpu.memory_space<vmem>>, %arg4: memref<3x128x128xf32, #tpu.memory_space<vmem>>, %arg5: memref<1x128xf32, #tpu.memory_space<vmem>>, %arg6: memref<2x8xf32, #tpu.memory_space<vmem>>, %arg7: memref<2x1xf32, #tpu.memory_space<vmem>>, %arg8: memref<2x8xf32, #tpu.memory_space<vmem>>, %arg9: memref<1x8xf32, #tpu.memory_space<vmem>>, %arg10: memref<1x16x128xf32, #tpu.memory_space<vmem>>, %arg11: memref<18x128xf32, #tpu.memory_space<vmem>>) attributes {dimension_semantics = [#tpu.dimension_semantics<parallel>], iteration_bounds = array<i64: 2>, scalar_prefetch = 0 : i64, scratch_operands = 1 : i64, tpu.core_type = #tpu.core_type<tc>, window_params = [{transform_indices = @transform_0, window_bounds = array<i64: 1, 16, 128>}, {pipeline_mode = #tpu.pipeline_mode<synchronous>, transform_indices = @transform_1, window_bounds = array<i64: 3, 128, 128>}, {pipeline_mode = #tpu.pipeline_mode<synchronous>, transform_indices = @transform_2, window_bounds = array<i64: 1, 128>}, {pipeline_mode = #tpu.pipeline_mode<synchronous>, transform_indices = @transform_3, window_bounds = array<i64: 3, 128, 128>}, {pipeline_mode = #tpu.pipeline_mode<synchronous>, transform_indices = @transform_4, window_bounds = array<i64: 1, 128>}, {pipeline_mode = #tpu.pipeline_mode<synchronous>, transform_indices = @transform_5, window_bounds = array<i64: 2, 8>}, {pipeline_mode = #tpu.pipeline_mode<synchronous>, transform_indices = @transform_6, window_bounds = array<i64: 2, 1>}, {pipeline_mode = #tpu.pipeline_mode<synchronous>, transform_indices = @transform_7, window_bounds = array<i64: 2, 8>}, {pipeline_mode = #tpu.pipeline_mode<synchronous>, transform_indices = @transform_8, window_bounds = array<i64: 1, 8>}, {transform_indices = @transform_9, window_bounds = array<i64: 1, 16, 128>}]} {
    %c0 = arith.constant 0 : index
    %c0_0 = arith.constant 0 : index
    %c0_1 = arith.constant 0 : index
    %0 = vector.load %arg1[%c0, %c0_0, %c0_1] : memref<1x16x128xf32, #tpu.memory_space<vmem>>, vector<1x16x128xf32>
    %1 = vector.shape_cast %0 : vector<1x16x128xf32> to vector<16x128xf32>
    %cst = arith.constant 0.000000e+00 : f32
    %2 = vector.broadcast %cst : f32 to vector<18x128xf32>
    %c0_2 = arith.constant 0 : index
    %c0_3 = arith.constant 0 : index
    %3 = vector.load %arg11[%c0_2, %c0_3] : memref<18x128xf32, #tpu.memory_space<vmem>>, vector<18x128xf32>
    tpu.vector_store %arg11[%c0_2, %c0_3], %2 {strides = array<i32>} : memref<18x128xf32, #tpu.memory_space<vmem>>, vector<18x128xf32>,
    %c1 = arith.constant 1 : index
    %c0_4 = arith.constant 0 : index
    %4 = vector.load %arg11[%c1, %c0_4] : memref<18x128xf32, #tpu.memory_space<vmem>>, vector<16x128xf32>
    tpu.vector_store %arg11[%c1, %c0_4], %1 {strides = array<i32>} : memref<18x128xf32, #tpu.memory_space<vmem>>, vector<16x128xf32>,
    %c0_5 = arith.constant 0 : index
    %c0_6 = arith.constant 0 : index
    %5 = vector.load %arg11[%c0_5, %c0_6] : memref<18x128xf32, #tpu.memory_space<vmem>>, vector<16x128xf32>
    %c0_7 = arith.constant 0 : index
    %c0_8 = arith.constant 0 : index
    %c0_9 = arith.constant 0 : index
    %6 = vector.load %arg2[%c0_7, %c0_8, %c0_9] : memref<3x128x128xf32, #tpu.memory_space<vmem>>, vector<1x128x128xf32>
    %7 = vector.shape_cast %6 : vector<1x128x128xf32> to vector<128x128xf32>
    %cst_10 = arith.constant dense<0.000000e+00> : vector<16x128xf32>
    %8 = tpu.matmul %5, %7, %cst_10 {dimension_numbers = #tpu.dot_dimension_numbers<[1], [0], [0], [1], [0, 0, 1, 1], [], []>} : vector<16x128xf32>, vector<128x128xf32>, vector<16x128xf32> -> vector<16x128xf32>
    %c1_11 = arith.constant 1 : index
    %c0_12 = arith.constant 0 : index
    %9 = vector.load %arg11[%c1_11, %c0_12] : memref<18x128xf32, #tpu.memory_space<vmem>>, vector<16x128xf32>
    %c1_13 = arith.constant 1 : index
    %c0_14 = arith.constant 0 : index
    %c0_15 = arith.constant 0 : index
    %10 = vector.load %arg2[%c1_13, %c0_14, %c0_15] : memref<3x128x128xf32, #tpu.memory_space<vmem>>, vector<1x128x128xf32>
    %11 = vector.shape_cast %10 : vector<1x128x128xf32> to vector<128x128xf32>
    %cst_16 = arith.constant dense<0.000000e+00> : vector<16x128xf32>
    %12 = tpu.matmul %9, %11, %cst_16 {dimension_numbers = #tpu.dot_dimension_numbers<[1], [0], [0], [1], [0, 0, 1, 1], [], []>} : vector<16x128xf32>, vector<128x128xf32>, vector<16x128xf32> -> vector<16x128xf32>
    %13 = arith.addf %8, %12 : vector<16x128xf32>
    %c2 = arith.constant 2 : index
    %c0_17 = arith.constant 0 : index
    %14 = vector.load %arg11[%c2, %c0_17] : memref<18x128xf32, #tpu.memory_space<vmem>>, vector<16x128xf32>
    %c2_18 = arith.constant 2 : index
    %c0_19 = arith.constant 0 : index
    %c0_20 = arith.constant 0 : index
    %15 = vector.load %arg2[%c2_18, %c0_19, %c0_20] : memref<3x128x128xf32, #tpu.memory_space<vmem>>, vector<1x128x128xf32>
    %16 = vector.shape_cast %15 : vector<1x128x128xf32> to vector<128x128xf32>
    %cst_21 = arith.constant dense<0.000000e+00> : vector<16x128xf32>
    %17 = tpu.matmul %14, %16, %cst_21 {dimension_numbers = #tpu.dot_dimension_numbers<[1], [0], [0], [1], [0, 0, 1, 1], [], []>} : vector<16x128xf32>, vector<128x128xf32>, vector<16x128xf32> -> vector<16x128xf32>
    %18 = arith.addf %13, %17 : vector<16x128xf32>
    %c0_22 = arith.constant 0 : index
    %c0_23 = arith.constant 0 : index
    %19 = vector.load %arg3[%c0_22, %c0_23] : memref<1x128xf32, #tpu.memory_space<vmem>>, vector<1x128xf32>
    %20 = vector.broadcast %19 : vector<1x128xf32> to vector<16x128xf32>
    %21 = arith.addf %18, %20 : vector<16x128xf32>
    %cst_24 = arith.constant 0.000000e+00 : f32
    %22 = vector.broadcast %cst_24 : f32 to vector<16x128xf32>
    %23 = arith.maximumf %21, %22 : vector<16x128xf32>
    %c1_25 = arith.constant 1 : index
    %c0_26 = arith.constant 0 : index
    %24 = vector.load %arg11[%c1_25, %c0_26] : memref<18x128xf32, #tpu.memory_space<vmem>>, vector<16x128xf32>
    tpu.vector_store %arg11[%c1_25, %c0_26], %23 {strides = array<i32>} : memref<18x128xf32, #tpu.memory_space<vmem>>, vector<16x128xf32>,
    %c0_27 = arith.constant 0 : index
    %c0_28 = arith.constant 0 : index
    %25 = vector.load %arg11[%c0_27, %c0_28] : memref<18x128xf32, #tpu.memory_space<vmem>>, vector<16x128xf32>
    %c0_29 = arith.constant 0 : index
    %c0_30 = arith.constant 0 : index
    %c0_31 = arith.constant 0 : index
    %26 = vector.load %arg4[%c0_29, %c0_30, %c0_31] : memref<3x128x128xf32, #tpu.memory_space<vmem>>, vector<1x128x128xf32>
    %27 = vector.shape_cast %26 : vector<1x128x128xf32> to vector<128x128xf32>
    %cst_32 = arith.constant dense<0.000000e+00> : vector<16x128xf32>
    %28 = tpu.matmul %25, %27, %cst_32 {dimension_numbers = #tpu.dot_dimension_numbers<[1], [0], [0], [1], [0, 0, 1, 1], [], []>} : vector<16x128xf32>, vector<128x128xf32>, vector<16x128xf32> -> vector<16x128xf32>
    %c1_33 = arith.constant 1 : index
    %c0_34 = arith.constant 0 : index
    %29 = vector.load %arg11[%c1_33, %c0_34] : memref<18x128xf32, #tpu.memory_space<vmem>>, vector<16x128xf32>
    %c1_35 = arith.constant 1 : index
    %c0_36 = arith.constant 0 : index
    %c0_37 = arith.constant 0 : index
    %30 = vector.load %arg4[%c1_35, %c0_36, %c0_37] : memref<3x128x128xf32, #tpu.memory_space<vmem>>, vector<1x128x128xf32>
    %31 = vector.shape_cast %30 : vector<1x128x128xf32> to vector<128x128xf32>
    %cst_38 = arith.constant dense<0.000000e+00> : vector<16x128xf32>
    %32 = tpu.matmul %29, %31, %cst_38 {dimension_numbers = #tpu.dot_dimension_numbers<[1], [0], [0], [1], [0, 0, 1, 1], [], []>} : vector<16x128xf32>, vector<128x128xf32>, vector<16x128xf32> -> vector<16x128xf32>
    %33 = arith.addf %28, %32 : vector<16x128xf32>
    %c2_39 = arith.constant 2 : index
    %c0_40 = arith.constant 0 : index
    %34 = vector.load %arg11[%c2_39, %c0_40] : memref<18x128xf32, #tpu.memory_space<vmem>>, vector<16x128xf32>
    %c2_41 = arith.constant 2 : index
    %c0_42 = arith.constant 0 : index
    %c0_43 = arith.constant 0 : index
    %35 = vector.load %arg4[%c2_41, %c0_42, %c0_43] : memref<3x128x128xf32, #tpu.memory_space<vmem>>, vector<1x128x128xf32>
    %36 = vector.shape_cast %35 : vector<1x128x128xf32> to vector<128x128xf32>
    %cst_44 = arith.constant dense<0.000000e+00> : vector<16x128xf32>
    %37 = tpu.matmul %34, %36, %cst_44 {dimension_numbers = #tpu.dot_dimension_numbers<[1], [0], [0], [1], [0, 0, 1, 1], [], []>} : vector<16x128xf32>, vector<128x128xf32>, vector<16x128xf32> -> vector<16x128xf32>
    %38 = arith.addf %33, %37 : vector<16x128xf32>
    %c0_45 = arith.constant 0 : index
    %c0_46 = arith.constant 0 : index
    %39 = vector.load %arg5[%c0_45, %c0_46] : memref<1x128xf32, #tpu.memory_space<vmem>>, vector<1x128xf32>
    %40 = vector.broadcast %39 : vector<1x128xf32> to vector<16x128xf32>
    %41 = arith.addf %38, %40 : vector<16x128xf32>
    %cst_47 = arith.constant dense<0.000000e+00> : vector<128xf32>
    %42 = vector.multi_reduction <add>, %41, %cst_47 [0] : vector<16x128xf32> to vector<128xf32>
    %43 = vector.shape_cast %42 : vector<128xf32> to vector<1x128xf32>
    %44 = vector.extract_strided_slice %43 {offsets = [0, 0], sizes = [1, 8], strides = [1, 1]} : vector<1x128xf32> to vector<1x8xf32>
    %45 = vector.extract_strided_slice %43 {offsets = [0, 8], sizes = [1, 8], strides = [1, 1]} : vector<1x128xf32> to vector<1x8xf32>
    %46 = arith.addf %44, %45 : vector<1x8xf32>
    %47 = vector.extract_strided_slice %43 {offsets = [0, 16], sizes = [1, 8], strides = [1, 1]} : vector<1x128xf32> to vector<1x8xf32>
    %48 = arith.addf %46, %47 : vector<1x8xf32>
    %49 = vector.extract_strided_slice %43 {offsets = [0, 24], sizes = [1, 8], strides = [1, 1]} : vector<1x128xf32> to vector<1x8xf32>
    %50 = arith.addf %48, %49 : vector<1x8xf32>
    %51 = vector.extract_strided_slice %43 {offsets = [0, 32], sizes = [1, 8], strides = [1, 1]} : vector<1x128xf32> to vector<1x8xf32>
    %52 = arith.addf %50, %51 : vector<1x8xf32>
    %53 = vector.extract_strided_slice %43 {offsets = [0, 40], sizes = [1, 8], strides = [1, 1]} : vector<1x128xf32> to vector<1x8xf32>
    %54 = arith.addf %52, %53 : vector<1x8xf32>
    %55 = vector.extract_strided_slice %43 {offsets = [0, 48], sizes = [1, 8], strides = [1, 1]} : vector<1x128xf32> to vector<1x8xf32>
    %56 = arith.addf %54, %55 : vector<1x8xf32>
    %57 = vector.extract_strided_slice %43 {offsets = [0, 56], sizes = [1, 8], strides = [1, 1]} : vector<1x128xf32> to vector<1x8xf32>
    %58 = arith.addf %56, %57 : vector<1x8xf32>
    %59 = vector.extract_strided_slice %43 {offsets = [0, 64], sizes = [1, 8], strides = [1, 1]} : vector<1x128xf32> to vector<1x8xf32>
    %60 = arith.addf %58, %59 : vector<1x8xf32>
    %61 = vector.extract_strided_slice %43 {offsets = [0, 72], sizes = [1, 8], strides = [1, 1]} : vector<1x128xf32> to vector<1x8xf32>
    %62 = arith.addf %60, %61 : vector<1x8xf32>
    %63 = vector.extract_strided_slice %43 {offsets = [0, 80], sizes = [1, 8], strides = [1, 1]} : vector<1x128xf32> to vector<1x8xf32>
    %64 = arith.addf %62, %63 : vector<1x8xf32>
    %65 = vector.extract_strided_slice %43 {offsets = [0, 88], sizes = [1, 8], strides = [1, 1]} : vector<1x128xf32> to vector<1x8xf32>
    %66 = arith.addf %64, %65 : vector<1x8xf32>
    %67 = vector.extract_strided_slice %43 {offsets = [0, 96], sizes = [1, 8], strides = [1, 1]} : vector<1x128xf32> to vector<1x8xf32>
    %68 = arith.addf %66, %67 : vector<1x8xf32>
    %69 = vector.extract_strided_slice %43 {offsets = [0, 104], sizes = [1, 8], strides = [1, 1]} : vector<1x128xf32> to vector<1x8xf32>
    %70 = arith.addf %68, %69 : vector<1x8xf32>
    %71 = vector.extract_strided_slice %43 {offsets = [0, 112], sizes = [1, 8], strides = [1, 1]} : vector<1x128xf32> to vector<1x8xf32>
    %72 = arith.addf %70, %71 : vector<1x8xf32>
    %73 = vector.extract_strided_slice %43 {offsets = [0, 120], sizes = [1, 8], strides = [1, 1]} : vector<1x128xf32> to vector<1x8xf32>
    %74 = arith.addf %72, %73 : vector<1x8xf32>
    %cst_48 = arith.constant 3.906250e-03 : f32
    %75 = vector.broadcast %cst_48 : f32 to vector<1x8xf32>
    %76 = arith.mulf %74, %75 : vector<1x8xf32>
    %c0_49 = arith.constant 0 : index
    %c0_50 = arith.constant 0 : index
    %77 = vector.load %arg6[%c0_49, %c0_50] : memref<2x8xf32, #tpu.memory_space<vmem>>, vector<2x8xf32>
    %78 = vector.broadcast %76 : vector<1x8xf32> to vector<2x8xf32>
    %79 = arith.mulf %78, %77 : vector<2x8xf32>
    %cst_51 = arith.constant dense<0.000000e+00> : vector<2xf32>
    %80 = vector.multi_reduction <add>, %79, %cst_51 [1] : vector<2x8xf32> to vector<2xf32>
    %81 = vector.shape_cast %80 : vector<2xf32> to vector<2x1xf32>
    %c0_52 = arith.constant 0 : index
    %c0_53 = arith.constant 0 : index
    %82 = vector.load %arg7[%c0_52, %c0_53] : memref<2x1xf32, #tpu.memory_space<vmem>>, vector<2x1xf32>
    %83 = arith.addf %81, %82 : vector<2x1xf32>
    %cst_54 = arith.constant 0.000000e+00 : f32
    %84 = vector.broadcast %cst_54 : f32 to vector<2x1xf32>
    %85 = arith.maximumf %83, %84 : vector<2x1xf32>
    %c0_55 = arith.constant 0 : index
    %c0_56 = arith.constant 0 : index
    %86 = vector.load %arg8[%c0_55, %c0_56] : memref<2x8xf32, #tpu.memory_space<vmem>>, vector<2x8xf32>
    %87 = vector.broadcast %85 : vector<2x1xf32> to vector<2x8xf32>
    %88 = arith.mulf %87, %86 : vector<2x8xf32>
    %cst_57 = arith.constant dense<0.000000e+00> : vector<8xf32>
    %89 = vector.multi_reduction <add>, %88, %cst_57 [0] : vector<2x8xf32> to vector<8xf32>
    %90 = vector.shape_cast %89 : vector<8xf32> to vector<1x8xf32>
    %c0_58 = arith.constant 0 : index
    %c0_59 = arith.constant 0 : index
    %91 = vector.load %arg9[%c0_58, %c0_59] : memref<1x8xf32, #tpu.memory_space<vmem>>, vector<1x8xf32>
    %92 = arith.addf %90, %91 : vector<1x8xf32>
    %93 = arith.negf %92 : vector<1x8xf32>
    %94 = math.exp %93 : vector<1x8xf32>
    %cst_60 = arith.constant 1.000000e+00 : f32
    %95 = vector.broadcast %cst_60 : f32 to vector<1x8xf32>
    %96 = arith.addf %95, %94 : vector<1x8xf32>
    %97 = arith.divf %95, %96 : vector<1x8xf32>
    %98 = tpu.concatenate %97, %97, %97, %97, %97, %97, %97, %97, %97, %97, %97, %97, %97, %97, %97, %97 in 1 : vector<1x8xf32>, vector<1x8xf32>, vector<1x8xf32>, vector<1x8xf32>, vector<1x8xf32>, vector<1x8xf32>, vector<1x8xf32>, vector<1x8xf32>, vector<1x8xf32>, vector<1x8xf32>, vector<1x8xf32>, vector<1x8xf32>, vector<1x8xf32>, vector<1x8xf32>, vector<1x8xf32>, vector<1x8xf32> -> vector<1x128xf32>
    %99 = vector.broadcast %98 : vector<1x128xf32> to vector<16x128xf32>
    %100 = arith.mulf %41, %99 : vector<16x128xf32>
    %101 = arith.addf %100, %1 : vector<16x128xf32>
    %c0_61 = arith.constant 0 : index
    %c0_62 = arith.constant 0 : index
    %c0_63 = arith.constant 0 : index
    %102 = vector.load %arg10[%c0_61, %c0_62, %c0_63] : memref<1x16x128xf32, #tpu.memory_space<vmem>>, vector<1x16x128xf32>
    %103 = vector.shape_cast %102 : vector<1x16x128xf32> to vector<16x128xf32>
    %104 = vector.shape_cast %101 : vector<16x128xf32> to vector<1x16x128xf32>
    tpu.vector_store %arg10[%c0_61, %c0_62, %c0_63], %104 {strides = array<i32>} : memref<1x16x128xf32, #tpu.memory_space<vmem>>, vector<1x16x128xf32>,
    return
  }
  func.func @transform_0(%arg0: i32) -> (i32, i32, i32) {
    %c0_i32 = arith.constant 0 : i32
    %c0_i32_0 = arith.constant 0 : i32
    %c0_i32_1 = arith.constant 0 : i32
    return %arg0, %c0_i32, %c0_i32_0 : i32, i32, i32
  }
  func.func @transform_1(%arg0: i32) -> (i32, i32, i32) {
    %c0_i32 = arith.constant 0 : i32
    %c0_i32_0 = arith.constant 0 : i32
    %c0_i32_1 = arith.constant 0 : i32
    %c0_i32_2 = arith.constant 0 : i32
    return %c0_i32, %c0_i32_0, %c0_i32_1 : i32, i32, i32
  }
  func.func @transform_2(%arg0: i32) -> (i32, i32) {
    %c0_i32 = arith.constant 0 : i32
    %c0_i32_0 = arith.constant 0 : i32
    %c0_i32_1 = arith.constant 0 : i32
    return %c0_i32, %c0_i32_0 : i32, i32
  }
  func.func @transform_3(%arg0: i32) -> (i32, i32, i32) {
    %c0_i32 = arith.constant 0 : i32
    %c0_i32_0 = arith.constant 0 : i32
    %c0_i32_1 = arith.constant 0 : i32
    %c0_i32_2 = arith.constant 0 : i32
    return %c0_i32, %c0_i32_0, %c0_i32_1 : i32, i32, i32
  }
  func.func @transform_4(%arg0: i32) -> (i32, i32) {
    %c0_i32 = arith.constant 0 : i32
    %c0_i32_0 = arith.constant 0 : i32
    %c0_i32_1 = arith.constant 0 : i32
    return %c0_i32, %c0_i32_0 : i32, i32
  }
  func.func @transform_5(%arg0: i32) -> (i32, i32) {
    %c0_i32 = arith.constant 0 : i32
    %c0_i32_0 = arith.constant 0 : i32
    %c0_i32_1 = arith.constant 0 : i32
    return %c0_i32, %c0_i32_0 : i32, i32
  }
  func.func @transform_6(%arg0: i32) -> (i32, i32) {
    %c0_i32 = arith.constant 0 : i32
    %c0_i32_0 = arith.constant 0 : i32
    %c0_i32_1 = arith.constant 0 : i32
    return %c0_i32, %c0_i32_0 : i32, i32
  }
  func.func @transform_7(%arg0: i32) -> (i32, i32) {
    %c0_i32 = arith.constant 0 : i32
    %c0_i32_0 = arith.constant 0 : i32
    %c0_i32_1 = arith.constant 0 : i32
    return %c0_i32, %c0_i32_0 : i32, i32
  }
  func.func @transform_8(%arg0: i32) -> (i32, i32) {
    %c0_i32 = arith.constant 0 : i32
    %c0_i32_0 = arith.constant 0 : i32
    %c0_i32_1 = arith.constant 0 : i32
    return %c0_i32, %c0_i32_0 : i32, i32
  }
  func.func @transform_9(%arg0: i32) -> (i32, i32, i32) {
    %c0_i32 = arith.constant 0 : i32
    %c0_i32_0 = arith.constant 0 : i32
    %c0_i32_1 = arith.constant 0 : i32
    return %arg0, %c0_i32, %c0_i32_0 : i32, i32, i32
  }
}

</mosaic_0001>

<bundles_post_ra>
// kernel: tpu_custom_call.1
= control target key start
LH: loop header
LB: loop body
LE: loop exit
PB: predicated region body
PF: predicated region fallthrough
CT: control target
= control target key end

     0   :  { %14 = vsyncpa [#allocation4], 0  ;;  %s2457_s0 = inlined_call_operand.hbm [shape: f32[2,16,128], index: 0, kind: input, shape index: {}]   ;;  %s2458_s1 = inlined_call_operand.hbm [shape: f32[3,128,128], index: 1, kind: input, shape index: {}]   ;;  %s2459_s2 = inlined_call_operand.vmem [shape: f32[1,128], index: 2, kind: input, shape index: {}]   ;;  %s2460_s3 = inlined_call_operand.hbm [shape: f32[3,128,128], index: 3, kind: input, shape index: {}]   ;;  %s2461_s4 = inlined_call_operand.vmem [shape: f32[1,128], index: 4, kind: input, shape index: {}]   ;;  %s2462_s5 = inlined_call_operand.vmem [shape: f32[2,8], index: 5, kind: input, shape index: {}]   ;;  %s2463_s6 = inlined_call_operand.vmem [shape: f32[2,1], index: 6, kind: input, shape index: {}]   ;;  %s2464_s7 = inlined_call_operand.vmem [shape: f32[2,8], index: 7, kind: input, shape index: {}]   ;;  %s2465_s8 = inlined_call_operand.vmem [shape: f32[1,8], index: 8, kind: input, shape index: {}]   ;;  %s2466_s9 = inlined_call_operand.hbm [shape: f32[2,16,128], index: 9, kind: output, shape index: {}]  }
   0x1   :  { %16 = vsyncpa [#allocation4 + $0x1], 0 }
   0x2   :  { %17 = vsyncpa [#allocation7], 0 }
   0x3   :  { %18 = vsyncpa [#allocation5], 0 }
   0x4   :  { %20 = vsyncpa [#allocation5 + $0x1], 0  ;;  %s2136_s30 = smov 0   ;;  %s2138_s10 = smov 0  }
   0x5   :  { %s2140_s11 = smov 0   ;;  %s2142_s12 = smov 0  }
   0x6 LB: > { %s2157_s13 = sadd.s32 4294967295, %s2060_s12   ;;  %s1271_s14 = sadd.s32 4294967294, %s2060_s12   ;;  %s2060_s12 = sphi %s2142_s12, %s2513_s12   ;;  %s2056_s11 = sphi %s2140_s11, %s2512_s11   ;;  %s2052_s10 = sphi %s2138_s10, %s2511_s10   ;;  %s2048_s30 = sphi %s2136_s30, %s2510_s30  }
   0x7   : > { %p46_p0 = scmp.ne.s32.totalorder %s2052_s10, %s2048_s30  ;;  %p2467_p1 = scmp.eq.s32.totalorder %s2157_s13, 0 }
   0x8   : > { %p244_p3 = scmp.eq.s32.totalorder %s1271_s14, 1  ;;  %p1272_p5 = scmp.ge.s32.totalorder %s2060_s12, 1 }
   0x9   : > { %p2166_p4 = por %p2467_p1, %p46_p0  ;;  %p251_p7 = scmp.lt.s32.totalorder %s2060_s12, 3 }
   0xa   : > { %p2171_p6 = por %p244_p3, %p46_p0  ;;  %s2062_s18 = smov [#allocation6]  }
   0xb   : > { %s2483_s15 = scalar_select %p2166_p4, 1, 0 }
   0xc   : > { %s2484_s16 = scalar_select %p2171_p6, 1, 0 }
   0xd   : > { %p2176_p8 = pnand %p1272_p5, %p251_p7  ;;  %s263_s19 = sshll.u32 %s2062_s18, 4  ;;  %s2180_s19 = int_to_ptr.vmem [resolvable:$true] %s263_s19 }
   0xe   : > { %2485 = sst [smem:[#allocation13_spill]] %s2484_s16  ;;  %s2063_s21 = smov [#allocation8]  }
   0xf   : > { %p1824_p9 = pneg %p2176_p8  ;;  %s279_s22 = sshll.u32 %s2063_s21, 4  ;;  %s2191_s22 = int_to_ptr.vmem [resolvable:$true] %s279_s22 }
  0x10   : > { %s1904_s25 = scalar_lea.hbm %s2458_s1, 6144 }
  0x11   : > { %p2187_p11 = pnand %p1824_p9, %p2467_p1  ;;  %p1905_p12 = scmp.ne.s32.totalorder %s2458_s1, %s1904_s25 }
  0x12   : > { %p1911_p5 = scmp.lt.u32.totalorder %s1904_s25, %s2458_s1 }
  0x13   : > { %p1906_p13 = pneg %p2187_p11 }
  0x15   : > { %p1907_p0 = pnand %p1906_p13, %p1905_p12 }
  0x17   : > { %p1908_p3 = pneg %p1907_p0 }
  0x19   : > { %p1913_p7 = pnand %p1911_p5, %p1908_p3 }
  0x1b   : > { %1916 = shalt.err (!%p1913_p7)
}
  0x1c   : > { %s1917_s14 = scalar_lea.vmem %s2180_s19, 6144  ;;  %p1925_p2 = scmp.lt.s32.totalorder %s2180_s19, %s2180_s19 }
  0x1d   : > { %p1918_p9 = scmp.ne.s32.totalorder %s2180_s19, %s1917_s14  ;;  %p1926_p12 = scmp.lt.s32.totalorder %s1917_s14, %s1917_s14 }
  0x1f   : > { %p1920_p10 = pnand %p1918_p9, %p1906_p13  ;;  %p1927_p0 = por %p1926_p12, %p1925_p2 }
  0x21   : > { %p1921_p1 = pneg %p1920_p10 }
  0x23   : > { %p1928_p6 = pnand %p1927_p0, %p1921_p1 }
  0x25   : > { %1931 = shalt.err (!%p1928_p6)
}
  0x26   : > { %s2469_s18 = smov 128   ;;  %s2470_s21 = smov 8  }
  0x27   : > { %1827 = dma.hbm_to_vmem [thread:$0]  (!%p2187_p11), %s2458_s1, 6144, %s2180_s19, [#allocation7], %s2469_s18, %s2469_s18, %s2470_s21  }
  0x28   : > { %s1932_s27 = scalar_lea.hbm %s2460_s3, 6144 }
  0x29   : > { %p1933_p1 = scmp.ne.s32.totalorder %s2460_s3, %s1932_s27  ;;  %p1939_p10 = scmp.lt.u32.totalorder %s1932_s27, %s2460_s3 }
  0x2b   : > { %p1935_p2 = pnand %p1933_p1, %p1906_p13 }
  0x2d   : > { %p1936_p6 = pneg %p1935_p2 }
  0x2f   : > { %p1941_p3 = pnand %p1939_p10, %p1936_p6 }
  0x31   : > { %1944 = shalt.err (!%p1941_p3)
}
  0x32   : > { %s1945_s19 = scalar_lea.vmem %s2191_s22, 6144  ;;  %p1953_p12 = scmp.lt.s32.totalorder %s2191_s22, %s2191_s22 }
  0x33   : > { %p1946_p5 = scmp.ne.s32.totalorder %s2191_s22, %s1945_s19  ;;  %p1954_p0 = scmp.lt.s32.totalorder %s1945_s19, %s1945_s19 }
  0x35   : > { %p1948_p7 = pnand %p1946_p5, %p1906_p13  ;;  %p1955_p1 = por %p1954_p0, %p1953_p12 }
  0x37   : > { %p1949_p9 = pneg %p1948_p7 }
  0x39   : > { %p1956_p2 = pnand %p1955_p1, %p1949_p9 }
  0x3b   : > { %1959 = shalt.err (!%p1956_p2)
}
  0x3c   : > { %1830 = dma.hbm_to_vmem [thread:$0]  (!%p2187_p11), %s2460_s3, 6144, %s2191_s22, [#allocation7], %s2469_s18, %s2469_s18, %s2470_s21  }
  0x3d   : > { %s2252_s20 = sadd.s32 1, %s2060_s12   ;;  %s33_s24 = sadd.s32 1, %s2056_s11 }
  0x3e   : > { %s30_s25 = ssub.s32 %s2060_s12, %s2252_s20  ;;  %p40_p13 = scmp.ne.s32.totalorder %s2056_s11, %s2052_s10 }
  0x3f   : > { %p31_p6 = scmp.eq.s32.totalorder %s30_s25, 0  ;;  %p41_p10 = scmp.eq.s32.totalorder %s2060_s12, 0 }
  0x40   : > { %p2488_p3 = scmp.eq.s32.totalorder %s2157_s13, 1  ;;  %p1841_p7 = scmp.lt.s32.totalorder %s2060_s12, 2 }
  0x41   : > { %s2268_s27 = scalar_select %p31_p6, %s2056_s11, %s33_s24  }
  0x42   : > { %p2262_p5 = por %p2488_p3, %p40_p13  ;;  %p42_p9 = por %p41_p10, %p40_p13 }
  0x43   : > { %s308_s28 = sand.u32 1, %s2056_s11   ;;  %s1292_s22 = sshll.u32 %s2060_s12, 8 }
  0x44   : > { %s2489_s26 = scalar_select %p2262_p5, 1, 0 }
  0x45   : > { %s1276_s29 = sshll.u32 %s308_s28, 4  ;;  %s2275_s16 = scalar_lea.hbm %s2457_s0, %s1292_s22 }
  0x46   : > { %s312_s23 = scalar_lea.vmem [#allocation3], %s1276_s29  ;;  %p2279_p11 = pnand %p1841_p7, %p42_p9 }
  0x47   : > { %s319_s25 = sshll.u32 %s312_s23, 4  ;;  %s2283_s18 = scalar_lea.sflag [#allocation4], %s308_s28  ;;  %s2277_s25 = int_to_ptr.vmem [resolvable:$true] %s319_s25 }
  0x48   : > { %s1960_s21 = scalar_lea.hbm %s2275_s16, 256  ;;  %p1962_p0 = pneg %p2279_p11 }
  0x49   : > { %p1961_p12 = scmp.ne.s32.totalorder %s2275_s16, %s1960_s21  ;;  %s1965_s14 = scalar_lea.hbm %s2457_s0, 512 }
  0x4a   : > { %p1966_p13 = scmp.lt.u32.totalorder %s2275_s16, %s2457_s0  ;;  %p1967_p6 = scmp.lt.u32.totalorder %s1965_s14, %s1960_s21 }
  0x4b   : > { %p1963_p1 = pnand %p1962_p0, %p1961_p12  ;;  %p1969_p3 = scmp.lt.u32.totalorder %s1960_s21, %s2275_s16 }
  0x4c   : > { %p1968_p10 = por %p1967_p6, %p1966_p13 }
  0x4d   : > { %p1964_p2 = pneg %p1963_p1 }
  0x4e   : > { %p1970_p7 = por %p1969_p3, %p1968_p10 }
  0x50   : > { %p1971_p9 = pnand %p1970_p7, %p1964_p2 }
  0x52   : > { %1974 = shalt.err (!%p1971_p9)
}
  0x53   : > { %s1975_s28 = scalar_lea.vmem %s2277_s25, 256  ;;  %s2066_s29 = smov [#allocation3]  }
  0x54   : > { %p1976_p12 = scmp.ne.s32.totalorder %s2277_s25, %s1975_s28  ;;  %s1980_s22 = sshll.u32 %s2066_s29, 4  ;;  %s1981_s22 = int_to_ptr.vmem [resolvable:$false] %s1980_s22 }
  0x55   : > { %s1982_s19 = scalar_lea.vmem %s1981_s22, 512  ;;  %p1983_p4 = scmp.lt.s32.totalorder %s2277_s25, %s1981_s22 }
  0x56   : > { %p1978_p1 = pnand %p1976_p12, %p1962_p0  ;;  %p1984_p13 = scmp.lt.s32.totalorder %s1982_s19, %s1975_s28 }
  0x58   : > { %p1979_p5 = pneg %p1978_p1  ;;  %p1985_p6 = por %p1984_p13, %p1983_p4 }
  0x5a   : > { %p1986_p10 = pnand %p1985_p6, %p1979_p5 }
  0x5c   : > { %1989 = shalt.err (!%p1986_p10)
}
  0x5d   : > { %s2491_s21 = smov 8   ;;  %s2492_s14 = smov 128  }
  0x5e   : > { %1834 = dma.hbm_to_vmem [thread:$0]  (!%p2279_p11), %s2275_s16, 256, %s2277_s25, %s2283_s18, %s2492_s14, %s2492_s14, %s2491_s21  }
  0x5f   : > { %331 = sbr.rel (%p2176_p8) target bundleno = 1369 (0x559), region = 56  ;;  %s2317_s23 = sand.u32 (!%p2176_p8), 1, %s2052_s10  }
  0x60   : > { %s2473_s28 = sshll.u32 (!%p2176_p8), %s2317_s23, 4  ;;  %s334_s29 = scalar_lea.sflag (!%p2176_p8), [#allocation4], %s2317_s23 }
  0x61   : > { %s337_s24 = scalar_lea.vmem (!%p2176_p8), [#allocation3], %s2473_s28  ;;  %p2493_p4 = scmp.ne.s32.totalorder (!%p2176_p8), %s2483_s15, 0 }
  0x66   : > { %2035 = dma.done.wait (%p2493_p4), %s334_s29, 256  }
  0x67   : > { %2037 = vsyncadd (%p2493_p4), %s334_s29, 4294967040  ;;  %p2494_p5 = scmp.eq.s32.totalorder %s2157_s13, 0 }
  0x69   : > { %2039 = dma.done.wait (%p2494_p5), [#allocation7], 12288   ;;  %p2495_p8 = pmov %p2494_p5 }
  0x6a   : > { %v2067_v0 = vmov 0.0   ;;  %v408_v1 = vld [vmem:[#allocation6 + $0x80] sm:$0xff]  ;;  %v409_v2 = vld [vmem:[#allocation6 + $0x88] sm:$0xff]  ;;  %v410_v3 = vld [vmem:[#allocation6 + $0x90] sm:$0xff]  ;;  %s2068_s25 = smov 104   ;;  %s2069_s22 = smov 120  }
  0x6b   : > { %2041 = vsyncadd (%p2495_p8), [#allocation7], 4294955008  ;;  %382 = vst [vmem:[#allocation2] sm:$0xff] %v2067_v0  ;;  %v1612_v4 = vpack.c.bf16 %v409_v2, %v408_v1  ;;  %v411_v5 = vld [vmem:[#allocation6 + $0x98] sm:$0xff]  ;;  %v412_v7 = vld [vmem:[#allocation6 + $0xa0] sm:$0xff]  ;;  %s2475_s19 = smov 96  }
  0x6c   : > { %383 = vst [vmem:[#allocation2 + $0x8] sm:$0xff] %v2067_v0  ;;  %384 = vst [vmem:[#allocation2 + $0x10] sm:$0x3] %v2067_v0  ;;  %v1616_v6 = vpack.c.bf16 %v411_v5, %v410_v3  ;;  %v413_v8 = vld [vmem:[#allocation6 + $0xa8] sm:$0xff]  ;;  %v2331_v10 = vld [vmem:[%s337_s24] sm:$0xff]  ;;  %s2474_s21 = smov 112  }
  0x6d   : > { %1613 = vmatprep.subr.bf16.mxu0 %v1612_v4  ;;  %v1620_v9 = vpack.c.bf16 %v413_v8, %v412_v7  ;;  %v414_v11 = vld [vmem:[#allocation6 + $0xb0] sm:$0xff]  ;;  %v415_v12 = vld [vmem:[#allocation6 + $0xb8] sm:$0xff]  ;;  %385 = vst [vmem:[#allocation2 + $0x1] sm:$0xff] %v2331_v10  ;;  %1434 = vmatprep.mubr.f32.mxu0 %v2331_v10  ;;  %v416_v15 = vld [vmem:[#allocation6 + $0xc0] sm:$0xff]  ;;  %s2477_s14 = smov 80   ;;  %s2476_s29 = smov 88  }
  0x6e   : > { %1615 = vmatpush3.bf16.msra.mxu0 %v1612_v4  ;;  %v2335_v13 = vld [vmem:[%s337_s24 + $0x8] sm:$0xff]  ;;  %v1624_v14 = vpack.c.bf16 %v415_v12, %v414_v11  ;;  %v418_v18 = vld [vmem:[#allocation6 + $0xd0] sm:$0xff]  ;;  %v420_v21 = vld [vmem:[#allocation6 + $0xe0] sm:$0xff]  ;;  %s2074_s24 = smov 64   ;;  %s2478_s15 = smov 72   ;;  %vm1050_vm0 = vcmask 58368  }
  0x6f   : > { %1617 = vmatprep.subr.bf16.mxu0 %v1616_v6  ;;  %386 = vst [vmem:[#allocation2 + $0x9] sm:$0xff] %v2335_v13  ;;  %v417_v16 = vld [vmem:[#allocation6 + $0xc8] sm:$0xff]  ;;  %v419_v19 = vld [vmem:[#allocation6 + $0xd8] sm:$0xff]  ;;  %v704_v23 = vld [vmem:[#allocation8 + $0x80] sm:$0xff]  ;;  %s2480_s17 = smov 48   ;;  %s2479_s18 = smov 56  }
  0x70   : > { %v1628_v17 = vpack.c.bf16 %v417_v16, %v416_v15  ;;  %v1632_v20 = vpack.c.bf16 %v419_v19, %v418_v18  ;;  %v421_v22 = vld [vmem:[#allocation6 + $0xe8] sm:$0xff]  ;;  %v706_v25 = vld [vmem:[#allocation8 + $0x90] sm:$0xff]  ;;  %v707_v27 = vld [vmem:[#allocation8 + $0x98] sm:$0xff]  ;;  %s2482_s16 = smov 32   ;;  %s2481_s28 = smov 40   ;;  %vm1125_vm1 = vcmask 64512  }
  0x71   : > { %v705_v24 = vld [vmem:[#allocation8 + $0x88] sm:$0xff]  ;;  %v1712_v28 = vpack.c.bf16 %v707_v27, %v706_v25  ;;  %v708_v29 = vld [vmem:[#allocation8 + $0xa0] sm:$0xff]  ;;  %v1636_v31 = vpack.c.bf16 %v421_v22, %v420_v21  ;;  %v422_v32 = vld [vmem:[#allocation6 + $0xf0] sm:$0xff]  ;;  %vm1127_vm2 = vcmask 130048   ;;  %vm1129_vm3 = vcmask 195584   ;;  %p2506_p0 = scmp.ne.s32.totalorder %s2489_s26, 0 }
  0x72   : > { %1619 = vmatpush3.bf16.msra.mxu0 %v1616_v6  ;;  %v1708_v26 = vpack.c.bf16 %v705_v24, %v704_v23  ;;  %v709_v30 = vld [vmem:[#allocation8 + $0xa8] sm:$0xff]  ;;  %v423_v33 = vld [vmem:[#allocation6 + $0xf8] sm:$0xff]  ;;  %v710_v35 = vld [vmem:[#allocation8 + $0xb0] sm:$0xff]  ;;  %vm1131_vm4 = vcmask 261120   ;;  %vm1133_vm5 = vcmask 326656   ;;  %vm1135_vm6 = vcmask 392192  }
  0x73   : > { %1621 = vmatprep.subr.bf16.mxu0 %v1620_v9  ;;  %v1716_v34 = vpack.c.bf16 %v709_v30, %v708_v29  ;;  %v711_v36 = vld [vmem:[#allocation8 + $0xb8] sm:$0xff]  ;;  %v1640_v37 = vpack.c.bf16 %v423_v33, %v422_v32  ;;  %v389_v38 = vld [vmem:[#allocation6] sm:$0xff]  ;;  %v390_v39 = vld [vmem:[#allocation6 + $0x8] sm:$0xff]  ;;  %vm1137_vm7 = vcmask 457728   ;;  %vm1139_vm8 = vcmask 523264  }
  0x74   : > { %1709 = vmatprep.subr.bf16.mxu1 %v1708_v26  ;;  %v1720_v40 = vpack.c.bf16 %v711_v36, %v710_v35  ;;  %v712_v41 = vld [vmem:[#allocation8 + $0xc0] sm:$0xff]  ;;  %v713_v42 = vld [vmem:[#allocation8 + $0xc8] sm:$0xff]  ;;  %v1644_v43 = vpack.c.bf16 %v390_v39, %v389_v38  ;;  %v391_v44 = vld [vmem:[#allocation6 + $0x10] sm:$0xff]  ;;  %vm1141_vm9 = vcmask 588800   ;;  %vm1143_vm10 = vcmask 654336  }
  0x75   : > { %1711 = vmatpush3.bf16.msra.mxu1 %v1708_v26  ;;  %v392_v45 = vld [vmem:[#allocation6 + $0x18] sm:$0xff]  ;;  %v1724_v46 = vpack.c.bf16 %v713_v42, %v712_v41  ;;  %v387_v48 = vld [vmem:[#allocation2] sm:$0xff]  ;;  %v393_v49 = vld [vmem:[#allocation6 + $0x20] sm:$0xff]  ;;  %vm1145_vm11 = vcmask 719872   ;;  %vm1147_vm12 = vcmask 785408   ;;  %vm1149_vm13 = vcmask 850944  }
  0x76   : > { %1623 = vmatpush3.bf16.msra.mxu0 %v1620_v9  ;;  %1713 = vmatprep.subr.bf16.mxu1 %v1712_v28  ;;  %v1648_v47 = vpack.c.bf16 %v392_v45, %v391_v44  ;;  %v394_v50 = vld [vmem:[#allocation6 + $0x28] sm:$0xff]  ;;  %v395_v52 = vld [vmem:[#allocation6 + $0x30] sm:$0xff]  ;;  %v396_v53 = vld [vmem:[#allocation6 + $0x38] sm:$0xff]  ;;  %vm1151_vm14 = vcmask 916480   ;;  %vm1153_vm15 = vcmask 982016  }
  0x77   : > { %1625 = vmatprep.subr.bf16.mxu0 %v1624_v14  ;;  %v1652_v51 = vpack.c.bf16 %v394_v50, %v393_v49  ;;  %v1656_v54 = vpack.c.bf16 %v396_v53, %v395_v52  ;;  %v397_v55 = vld [vmem:[#allocation6 + $0x40] sm:$0xff]  ;;  %v398_v56 = vld [vmem:[#allocation6 + $0x48] sm:$0xff]  ;;  %v399_v58 = vld [vmem:[#allocation6 + $0x50] sm:$0xff] }
  0x78   : > { %v1660_v57 = vpack.c.bf16 %v398_v56, %v397_v55  ;;  %v400_v59 = vld [vmem:[#allocation6 + $0x58] sm:$0xff]  ;;  %v401_v61 = vld [vmem:[#allocation6 + $0x60] sm:$0xff]  ;;  %v402_v62 = vld [vmem:[#allocation6 + $0x68] sm:$0xff] }
  0x79   : > { %1715 = vmatpush3.bf16.msra.mxu1 %v1712_v28  ;;  %v1664_v60 = vpack.c.bf16 %v400_v59, %v399_v58  ;;  %v1668_v63 = vpack.c.bf16 %v402_v62, %v401_v61  ;;  %v403_v0 = vld [vmem:[#allocation6 + $0x70] sm:$0xff]  ;;  %v404_v1 = vld [vmem:[#allocation6 + $0x78] sm:$0xff]  ;;  %v577_v3 = vld [vmem:[#allocation6 + $0x100] sm:$0xff] }
  0x7a   : > { %1627 = vmatpush3.bf16.msra.mxu0 %v1624_v14  ;;  %1717 = vmatprep.subr.bf16.mxu1 %v1716_v34  ;;  %v1672_v2 = vpack.c.bf16 %v404_v1, %v403_v0  ;;  %v578_v4 = vld [vmem:[#allocation6 + $0x108] sm:$0xff]  ;;  %v579_v6 = vld [vmem:[#allocation6 + $0x110] sm:$0xff]  ;;  %v580_v7 = vld [vmem:[#allocation6 + $0x118] sm:$0xff] }
  0x7b   : > { %1629 = vmatprep.subr.bf16.mxu0 %v1628_v17  ;;  %v1676_v5 = vpack.c.bf16 %v578_v4, %v577_v3  ;;  %v388_v8 = vld [vmem:[#allocation2 + $0x8] sm:$0xff]  ;;  %v1680_v9 = vpack.c.bf16 %v580_v7, %v579_v6  ;;  %v581_v12 = vld [vmem:[#allocation6 + $0x120] sm:$0xff]  ;;  %v582_v14 = vld [vmem:[#allocation6 + $0x128] sm:$0xff] }
  0x7c   : > { %v574_v11 = vld [vmem:[#allocation2 + $0x2] sm:$0xff]  ;;  %v1684_v15 = vpack.c.bf16 %v582_v14, %v581_v12  ;;  %v585_v19 = vld [vmem:[#allocation6 + $0x140] sm:$0xff]  ;;  %v588_v23 = vld [vmem:[#allocation6 + $0x158] sm:$0xff] }
  0x7d   : > { %1719 = vmatpush3.bf16.msra.mxu1 %v1716_v34  ;;  %v583_v16 = vld [vmem:[#allocation6 + $0x130] sm:$0xff]  ;;  %v589_v25 = vld [vmem:[#allocation6 + $0x160] sm:$0xff]  ;;  %v590_v26 = vld [vmem:[#allocation6 + $0x168] sm:$0xff] }
  0x7e   : > { %1631 = vmatpush3.bf16.msra.mxu0 %v1628_v17  ;;  %1721 = vmatprep.subr.bf16.mxu1 %v1720_v40  ;;  %v584_v17 = vld [vmem:[#allocation6 + $0x138] sm:$0xff]  ;;  %v587_v22 = vld [vmem:[#allocation6 + $0x150] sm:$0xff]  ;;  %v1700_v27 = vpack.c.bf16 %v590_v26, %v589_v25  ;;  %v716_v35 = vld [vmem:[#allocation8 + $0xe0] sm:$0xff] }
  0x7f   : > { %1633 = vmatprep.subr.bf16.mxu0 %v1632_v20  ;;  %v1688_v18 = vpack.c.bf16 %v584_v17, %v583_v16  ;;  %v1696_v24 = vpack.c.bf16 %v588_v23, %v587_v22  ;;  %v591_v28 = vld [vmem:[#allocation6 + $0x170] sm:$0xff]  ;;  %v592_v29 = vld [vmem:[#allocation6 + $0x178] sm:$0xff]  ;;  %v717_v36 = vld [vmem:[#allocation8 + $0xe8] sm:$0xff] }
  0x80   : > { %v1704_v30 = vpack.c.bf16 %v592_v29, %v591_v28  ;;  %v714_v32 = vld [vmem:[#allocation8 + $0xd0] sm:$0xff]  ;;  %v715_v33 = vld [vmem:[#allocation8 + $0xd8] sm:$0xff]  ;;  %v685_v41 = vld [vmem:[#allocation8] sm:$0xff] }
  0x81   : > { %1723 = vmatpush3.bf16.msra.mxu1 %v1720_v40  ;;  %v1728_v34 = vpack.c.bf16 %v715_v33, %v714_v32  ;;  %v718_v38 = vld [vmem:[#allocation8 + $0xf0] sm:$0xff]  ;;  %v719_v39 = vld [vmem:[#allocation8 + $0xf8] sm:$0xff]  ;;  %v686_v42 = vld [vmem:[#allocation8 + $0x8] sm:$0xff] }
  0x82   : > { %1635 = vmatpush3.bf16.msra.mxu0 %v1632_v20  ;;  %1725 = vmatprep.subr.bf16.mxu1 %v1724_v46  ;;  %v586_v20 = vld [vmem:[#allocation6 + $0x148] sm:$0xff]  ;;  %v1736_v40 = vpack.c.bf16 %v719_v39, %v718_v38  ;;  %v687_v49 = vld [vmem:[#allocation8 + $0x10] sm:$0xff]  ;;  %v688_v50 = vld [vmem:[#allocation8 + $0x18] sm:$0xff] }
  0x83   : > { %1637 = vmatprep.subr.bf16.mxu0 %v1636_v31  ;;  %v1692_v21 = vpack.c.bf16 %v586_v20, %v585_v19  ;;  %v1284_v44 = vld [vmem:[%s2459_s2] ss:$0 sm:$0xff]  ;;  %v1744_v53 = vpack.c.bf16 %v688_v50, %v687_v49  ;;  %v692_v58 = vld [vmem:[#allocation8 + $0x38] sm:$0xff]  ;;  %v693_v61 = vld [vmem:[#allocation8 + $0x40] sm:$0xff] }
  0x84   : > { %v690_v55 = vld [vmem:[#allocation8 + $0x28] sm:$0xff]  ;;  %v695_v0 = vld [vmem:[#allocation8 + $0x50] sm:$0xff]  ;;  %v696_v1 = vld [vmem:[#allocation8 + $0x58] sm:$0xff] }
  0x85   : > { %1727 = vmatpush3.bf16.msra.mxu1 %v1724_v46  ;;  %v694_v62 = vld [vmem:[#allocation8 + $0x48] sm:$0xff]  ;;  %v697_v3 = vld [vmem:[#allocation8 + $0x60] sm:$0xff]  ;;  %v699_v6 = vld [vmem:[#allocation8 + $0x70] sm:$0xff] }
  0x86   : > { %1639 = vmatpush3.bf16.msra.mxu0 %v1636_v31  ;;  %v575_v31 = vld [vmem:[#allocation2 + $0xa] sm:$0xff]  ;;  %1729 = vmatprep.subr.bf16.mxu1 %v1728_v34  ;;  %v698_v4 = vld [vmem:[#allocation8 + $0x68] sm:$0xff]  ;;  %v881_v25 = vld [vmem:[#allocation8 + $0x140] sm:$0xff] }
  0x87   : > { %1641 = vmatprep.subr.bf16.mxu0 %v1640_v37  ;;  %v700_v7 = vld [vmem:[#allocation8 + $0x78] sm:$0xff]  ;;  %v875_v14 = vld [vmem:[#allocation8 + $0x110] sm:$0xff]  ;;  %v878_v19 = vld [vmem:[#allocation8 + $0x128] sm:$0xff] }
  0x88   : > { %v879_v22 = vld [vmem:[#allocation8 + $0x130] sm:$0xff]  ;;  %v880_v23 = vld [vmem:[#allocation8 + $0x138] sm:$0xff]  ;;  %v882_v26 = vld [vmem:[#allocation8 + $0x148] sm:$0xff] }
  0x89   : > { %1731 = vmatpush3.bf16.msra.mxu1 %v1728_v34  ;;  %v883_v28 = vld [vmem:[#allocation8 + $0x150] sm:$0xff]  ;;  %v884_v29 = vld [vmem:[#allocation8 + $0x158] sm:$0xff]  ;;  %v886_v32 = vld [vmem:[#allocation8 + $0x168] sm:$0xff] }
  0x8a   : > { %1643 = vmatpush3.bf16.msra.mxu0 %v1640_v37  ;;  %v1732_v37 = vpack.c.bf16 %v717_v36, %v716_v35  ;;  %v887_v34 = vld [vmem:[#allocation8 + $0x170] sm:$0xff]  ;;  %v888_v35 = vld [vmem:[#allocation8 + $0x178] sm:$0xff]  ;;  %v1285_v38 = vld [vmem:[%s2461_s4] ss:$0 sm:$0xff] }
  0x8b   : > { %1645 = vmatprep.subr.bf16.mxu0 %v1644_v43  ;;  %v1800_v36 = vpack.c.bf16 %v888_v35, %v887_v34 }
  0x8c   : > { %1733 = vmatprep.subr.bf16.mxu1 %v1732_v37 }
  0x8d   : > { %1435 = vmatmul.mubr.f32.vlgmr.msra.gmra.mrb[0].mxu0 %v2335_v13  ;;  %1735 = vmatpush3.bf16.msra.mxu1 %v1732_v37 }
  0x8e   : > { %1647 = vmatpush3.bf16.msra.mxu0 %v1644_v43  ;;  %1469 = vmatprep.mubr.f32.mxu0 %v387_v48  ;;  %v1740_v43 = vpack.c.bf16 %v686_v42, %v685_v41 }
  0x8f   : > { %1649 = vmatprep.subr.bf16.mxu0 %v1648_v47  ;;  %1737 = vmatprep.subr.bf16.mxu1 %v1736_v40 }
  0x91   : > { %1739 = vmatpush3.bf16.msra.mxu1 %v1736_v40 }
  0x92   : > { %1651 = vmatpush3.bf16.msra.mxu0 %v1648_v47  ;;  %1741 = vmatprep.subr.bf16.mxu1 %v1740_v43 }
  0x93   : > { %1653 = vmatprep.subr.bf16.mxu0 %v1652_v51 }
  0x96   : > { %1655 = vmatpush3.bf16.msra.mxu0 %v1652_v51 }
  0x97   : > { %1657 = vmatprep.subr.bf16.mxu0 %v1656_v54 }
  0x9a   : > { %1659 = vmatpush3.bf16.msra.mxu0 %v1656_v54  ;;  %v689_v54 = vld [vmem:[#allocation8 + $0x20] sm:$0xff] }
  0x9b   : > { %1661 = vmatprep.subr.bf16.mxu0 %v1660_v57  ;;  %v1748_v56 = vpack.c.bf16 %v690_v55, %v689_v54 }
  0x9e   : > { %1663 = vmatpush3.bf16.msra.mxu0 %v1660_v57  ;;  %v691_v57 = vld [vmem:[#allocation8 + $0x30] sm:$0xff] }
  0x9f   : > { %1665 = vmatprep.subr.bf16.mxu0 %v1664_v60 }
  0xa2   : > { %1667 = vmatpush3.bf16.msra.mxu0 %v1664_v60  ;;  %v1752_v60 = vpack.c.bf16 %v692_v58, %v691_v57 }
  0xa3   : > { %1669 = vmatprep.subr.bf16.mxu0 %v1668_v63 }
  0xa6   : > { %1671 = vmatpush3.bf16.msra.mxu0 %v1668_v63  ;;  %v1756_v63 = vpack.c.bf16 %v694_v62, %v693_v61 }
  0xa7   : > { %1673 = vmatprep.subr.bf16.mxu0 %v1672_v2 }
  0xaa   : > { %1675 = vmatpush3.bf16.msra.mxu0 %v1672_v2  ;;  %v1760_v2 = vpack.c.bf16 %v696_v1, %v695_v0 }
  0xab   : > { %1677 = vmatprep.subr.bf16.mxu0 %v1676_v5 }
  0xad   : > { %1470 = vmatmul.mubr.f32.vlgmr.msra.gmra.mrb[0].mxu0 %v388_v8  ;;  %v1768_v8 = vpack.c.bf16 %v700_v7, %v699_v6 }
  0xae   : > { %1679 = vmatpush3.bf16.msra.mxu0 %v1676_v5  ;;  %1504 = vmatprep.mubr.f32.mxu0 %v574_v11  ;;  %v1764_v5 = vpack.c.bf16 %v698_v4, %v697_v3  ;;  %v874_v11 = vld [vmem:[#allocation8 + $0x108] sm:$0xff] }
  0xaf   : > { %1681 = vmatprep.subr.bf16.mxu0 %v1680_v9 }
  0xb2   : > { %1683 = vmatpush3.bf16.msra.mxu0 %v1680_v9  ;;  %v873_v9 = vld [vmem:[#allocation8 + $0x100] sm:$0xff] }
  0xb3   : > { %1685 = vmatprep.subr.bf16.mxu0 %v1684_v15  ;;  %v1772_v12 = vpack.c.bf16 %v874_v11, %v873_v9  ;;  %v1045_v9 = vlaneseq }
  0xb6   : > { %1687 = vmatpush3.bf16.msra.mxu0 %v1684_v15  ;;  %v876_v15 = vld [vmem:[#allocation8 + $0x118] sm:$0xff] }
  0xb7   : > { %1689 = vmatprep.subr.bf16.mxu0 %v1688_v18  ;;  %v1776_v16 = vpack.c.bf16 %v876_v15, %v875_v14  ;;  %v2366_v15 = vshrl.u32 %v1045_v9, 7 }
  0xba   : > { %1691 = vmatpush3.bf16.msra.mxu0 %v1688_v18  ;;  %v877_v18 = vld [vmem:[#allocation8 + $0x120] sm:$0xff] }
  0xbb   : > { %1693 = vmatprep.subr.bf16.mxu0 %v1692_v21 }
  0xbe   : > { %1695 = vmatpush3.bf16.msra.mxu0 %v1692_v21  ;;  %v1780_v21 = vpack.c.bf16 %v878_v19, %v877_v18  ;;  %v1047_v19 = vsub.s32 0, %v2366_v15 }
  0xbf   : > { %1697 = vmatprep.subr.bf16.mxu0 %v1696_v24 }
  0xc2   : > { %1699 = vmatpush3.bf16.msra.mxu0 %v1696_v24  ;;  %v1784_v24 = vpack.c.bf16 %v880_v23, %v879_v22  ;;  %v1044_v22 = vld [vmem:[%s2462_s5] sm:$0x3] }
  0xc3   : > { %1701 = vmatprep.subr.bf16.mxu0 %v1700_v27 }
  0xc6   : > { %1703 = vmatpush3.bf16.msra.mxu0 %v1700_v27  ;;  %v1788_v27 = vpack.c.bf16 %v882_v26, %v881_v25  ;;  %v2083_v26 = vmov 0  }
  0xc7   : > { %1705 = vmatprep.subr.bf16.mxu0 %v1704_v30  ;;  %1899 = vset.pattern.permute.xlu0 %v2083_v26 }
  0xca   : > { %1707 = vmatpush3.bf16.msra.mxu0 %v1704_v30  ;;  %v1792_v30 = vpack.c.bf16 %v884_v29, %v883_v28 }
  0xcd   : > { %1505 = vmatmul.mubr.f32.vlgmr.msra.gmra.mrb[0].mxu0 %v575_v31  ;;  %v885_v31 = vld [vmem:[#allocation8 + $0x160] sm:$0xff] }
  0xce   : > { %v1796_v33 = vpack.c.bf16 %v886_v32, %v885_v31  ;;  %v1057_v31 = vld [vmem:[%s2464_s7] sm:$0x3] }
 0x1a0   : > { %v1506_v45 = vpop.f32.mrb[0].mxu0 }
 0x1a1   : > { %v678_v46 = vadd.f32 %v1506_v45, %v1284_v44  ;;  %v659_v47 = vpop.f32.mrb[1].mxu0 }
 0x1a2   : > { %v677_v48 = vadd.f32 %v1284_v44, %v659_v47 }
 0x1a3   : > { %v680_v51 = vmax.f32 %v678_v46, 0.0 }
 0x1a4   : > { %v679_v52 = vmax.f32 %v677_v48, 0.0 }
 0x1a5   : > { %682 = vst [vmem:[#allocation2 + $0x9] sm:$0xff] %v680_v51 }
 0x1a6   : > { %681 = vst [vmem:[#allocation2 + $0x1] sm:$0xff] %v679_v52  ;;  %1539 = vmatprep.mubr.f32.mxu1 %v679_v52 }
 0x1a7   : > { %1540 = vmatmul.mubr.f32.vlgmr.msra.gmra.mrb[0].mxu1 %v680_v51 }
 0x1a8   : > { %1743 = vmatpush3.bf16.msra.mxu1 %v1740_v43 }
 0x1a9   : > { %1745 = vmatprep.subr.bf16.mxu1 %v1744_v53 }
 0x1ac   : > { %1747 = vmatpush3.bf16.msra.mxu1 %v1744_v53  ;;  %v871_v37 = vld [vmem:[#allocation2 + $0xa] sm:$0xff] }
 0x1ad   : > { %v683_v59 = vld [vmem:[#allocation2] sm:$0xff]  ;;  %1749 = vmatprep.subr.bf16.mxu1 %v1748_v56  ;;  %v684_v17 = vld [vmem:[#allocation2 + $0x8] sm:$0xff] }
 0x1ae   : > { %1574 = vmatprep.mubr.f32.mxu1 %v683_v59  ;;  %v870_v20 = vld [vmem:[#allocation2 + $0x2] sm:$0xff] }
 0x1b0   : > { %1751 = vmatpush3.bf16.msra.mxu1 %v1748_v56 }
 0x1b1   : > { %1753 = vmatprep.subr.bf16.mxu1 %v1752_v60 }
 0x1b4   : > { %1755 = vmatpush3.bf16.msra.mxu1 %v1752_v60 }
 0x1b5   : > { %1757 = vmatprep.subr.bf16.mxu1 %v1756_v63 }
 0x1b8   : > { %1759 = vmatpush3.bf16.msra.mxu1 %v1756_v63 }
 0x1b9   : > { %1761 = vmatprep.subr.bf16.mxu1 %v1760_v2 }
 0x1bc   : > { %1763 = vmatpush3.bf16.msra.mxu1 %v1760_v2 }
 0x1bd   : > { %1765 = vmatprep.subr.bf16.mxu1 %v1764_v5 }
 0x1c0   : > { %1767 = vmatpush3.bf16.msra.mxu1 %v1764_v5 }
 0x1c1   : > { %1769 = vmatprep.subr.bf16.mxu1 %v1768_v8 }
 0x1c4   : > { %1771 = vmatpush3.bf16.msra.mxu1 %v1768_v8 }
 0x1c5   : > { %1773 = vmatprep.subr.bf16.mxu1 %v1772_v12 }
 0x1c7   : > { %1575 = vmatmul.mubr.f32.vlgmr.msra.gmra.mrb[0].mxu1 %v684_v17 }
 0x1c8   : > { %1775 = vmatpush3.bf16.msra.mxu1 %v1772_v12  ;;  %1609 = vmatprep.mubr.f32.mxu1 %v870_v20 }
 0x1c9   : > { %1777 = vmatprep.subr.bf16.mxu1 %v1776_v16 }
 0x1cc   : > { %1779 = vmatpush3.bf16.msra.mxu1 %v1776_v16 }
 0x1cd   : > { %1781 = vmatprep.subr.bf16.mxu1 %v1780_v21 }
 0x1d0   : > { %1783 = vmatpush3.bf16.msra.mxu1 %v1780_v21 }
 0x1d1   : > { %1785 = vmatprep.subr.bf16.mxu1 %v1784_v24 }
 0x1d4   : > { %1787 = vmatpush3.bf16.msra.mxu1 %v1784_v24 }
 0x1d5   : > { %1789 = vmatprep.subr.bf16.mxu1 %v1788_v27 }
 0x1d8   : > { %1791 = vmatpush3.bf16.msra.mxu1 %v1788_v27  ;;  %v1054_v27 = vld [vmem:[%s2463_s6] sm:$0x3] }
 0x1d9   : > { %1793 = vmatprep.subr.bf16.mxu1 %v1792_v30 }
 0x1dc   : > { %1795 = vmatpush3.bf16.msra.mxu1 %v1792_v30 }
 0x1dd   : > { %1797 = vmatprep.subr.bf16.mxu1 %v1796_v33 }
 0x1e0   : > { %1799 = vmatpush3.bf16.msra.mxu1 %v1796_v33 }
 0x1e1   : > { %1801 = vmatprep.subr.bf16.mxu1 %v1800_v36 }
 0x1e4   : > { %1803 = vmatpush3.bf16.msra.mxu1 %v1800_v36 }
 0x1e7   : > { %1610 = vmatmul.mubr.f32.vlgmr.msra.gmra.mrb[0].mxu1 %v871_v37 }
 0x2ba   : > { %v1611_v39 = vpop.f32.mrb[0].mxu1 }
 0x2bb   : > { %v2345_v40 = vadd.f32 %v1611_v39, %v1285_v38  ;;  %v955_v41 = vpop.f32.mrb[1].mxu1 }
 0x2bc   : > { %v2347_v42 = vadd.f32 %v1285_v38, %v955_v41  ;;  %v1071_v41 = vld [vmem:[%s2465_s8] sm:$0x1] }
 0x2be   : > { %v975_v43 = vadd.f32 %v2345_v40, %v2347_v42 }
 0x2c0   : > { %v976_v44 = vrot.slane %v975_v43, 4 }
 0x2c2   : > { %v977_v45 = vadd.f32 %v976_v44, %v975_v43 }
 0x2c4   : > { %v978_v46 = vrot.slane %v977_v45, 2 }
 0x2c6   : > { %v979_v47 = vadd.f32 %v978_v46, %v977_v45 }
 0x2c8   : > { %v980_v48 = vrot.slane %v979_v47, 1 }
 0x2ca   : > { %v981_v49 = vadd.f32 %v980_v48, %v979_v47 }
 0x2cc   : > { %991 = vrot.lane.b32.xlu1 %v981_v49, %s2068_s25  ;;  %983 = vrot.lane.b32.xlu0 %v981_v49, %s2069_s22 }
 0x2d0   : > { %995 = vrot.lane.b32.xlu1 %v981_v49, %s2475_s19  ;;  %987 = vrot.lane.b32.xlu0 %v981_v49, %s2474_s21  ;;  %s2080_s21 = smov 16   ;;  %s2081_s19 = smov 24  }
 0x2d4   : > { %1003 = vrot.lane.b32.xlu1 %v981_v49, %s2477_s14  ;;  %999 = vrot.lane.b32.xlu0 %v981_v49, %s2476_s29  ;;  %s2082_s29 = smov 8   ;;  %s2500_s14 = smov 72  }
 0x2d8   : > { %1011 = vrot.lane.b32.xlu1 %v981_v49, %s2074_s24  ;;  %1007 = vrot.lane.b32.xlu0 %v981_v49, %s2478_s15  ;;  %s2502_s15 = smov 88  }
 0x2dc   : > { %1019 = vrot.lane.b32.xlu1 %v981_v49, %s2480_s17  ;;  %1015 = vrot.lane.b32.xlu0 %v981_v49, %s2479_s18  ;;  %s2497_s17 = smov 40   ;;  %s2498_s18 = smov 48  }
 0x2e0   : > { %1027 = vrot.lane.b32.xlu1 %v981_v49, %s2482_s16  ;;  %1023 = vrot.lane.b32.xlu0 %v981_v49, %s2481_s28  ;;  %s2496_s28 = smov 32   ;;  %s2499_s16 = smov 56  }
 0x2e4   : > { %1035 = vrot.lane.b32.xlu1 %v981_v49, %s2080_s21  ;;  %1031 = vrot.lane.b32.xlu0 %v981_v49, %s2081_s19 }
 0x2e8   : > { %1039 = vrot.lane.b32.xlu0 %v981_v49, %s2082_s29 }
 0x33e   : > { %v992_v50 = vpop.permute.xlu1 %991  ;;  %v984_v51 = vpop.permute.xlu0 %983 }
 0x33f   : > { %v986_v52 = vadd.f32 %v984_v51, %v981_v49 }
 0x342   : > { %v996_v53 = vpop.permute.xlu1 %995  ;;  %v988_v54 = vpop.permute.xlu0 %987 }
 0x343   : > { %v990_v55 = vadd.f32 %v988_v54, %v986_v52 }
 0x345   : > { %v994_v56 = vadd.f32 %v992_v50, %v990_v55 }
 0x346   : > { %v1004_v57 = vpop.permute.xlu1 %1003  ;;  %v1000_v58 = vpop.permute.xlu0 %999 }
 0x347   : > { %v998_v59 = vadd.f32 %v996_v53, %v994_v56 }
 0x349   : > { %v1002_v60 = vadd.f32 %v1000_v58, %v998_v59 }
 0x34a   : > { %v1012_v61 = vpop.permute.xlu1 %1011  ;;  %v1008_v62 = vpop.permute.xlu0 %1007 }
 0x34b   : > { %v1006_v63 = vadd.f32 %v1004_v57, %v1002_v60 }
 0x34d   : > { %v1010_v0 = vadd.f32 %v1008_v62, %v1006_v63 }
 0x34e   : > { %v1020_v1 = vpop.permute.xlu1 %1019  ;;  %v1016_v2 = vpop.permute.xlu0 %1015 }
 0x34f   : > { %v1014_v3 = vadd.f32 %v1012_v61, %v1010_v0 }
 0x351   : > { %v1018_v4 = vadd.f32 %v1016_v2, %v1014_v3 }
 0x352   : > { %v1024_v5 = vpop.permute.xlu0 %1023  ;;  %v1028_v7 = vpop.permute.xlu1 %1027 }
 0x353   : > { %v1022_v6 = vadd.f32 %v1020_v1, %v1018_v4 }
 0x355   : > { %v1026_v8 = vadd.f32 %v1024_v5, %v1022_v6 }
 0x356   : > { %v1032_v11 = vpop.permute.xlu0 %1031  ;;  %v1036_v16 = vpop.permute.xlu1 %1035 }
 0x357   : > { %v1030_v12 = vadd.f32 %v1028_v7, %v1026_v8 }
 0x359   : > { %v1034_v14 = vadd.f32 %v1032_v11, %v1030_v12 }
 0x35a   : > { %v1040_v18 = vpop.permute.xlu0 %1039 }
 0x35b   : > { %v1038_v17 = vadd.f32 %v1036_v16, %v1034_v14 }
 0x35d   : > { %v1042_v20 = vadd.f32 %v1040_v18, %v1038_v17 }
 0x35f   : > { %v1043_v21 = vmul.f32 0.00390625, %v1042_v20 }
 0x361   : > { %v1048_v23 = vrot.slane %v1043_v21, %v1047_v19 }
 0x363   : > { %v1049_v24 = vmul.f32 %v1048_v23, %v1044_v22 }
 0x365   : > { %v1051_v25 = vsel %vm1050_vm0, %v1049_v24, 0.0 }
 0x366   : > { %1052 = vadd.xlane.f32.xlu1 %v1051_v25 }
 0x3f3   : > { %v1053_v28 = vpop.xlane.xlu1 %1052 }
 0x3f4   : > { %v1055_v29 = vadd.f32 %v1054_v27, %v1053_v28 }
 0x3f6   : > { %v1056_v30 = vmax.f32 %v1055_v29, 0.0 }
 0x3f8   : > { %1060 = vperm.xlu0 %1899, %v1056_v30  }
 0x477   : > { %v1061_v32 = vpop.permute.xlu0 %1060 }
 0x478   : > { %v1063_v33 = vmul.f32 %v1061_v32, %v1057_v31 }
 0x47a   : > { %v1064_v34 = vsel %vm1050_vm0, %v1063_v33, 0.0 }
 0x47b   : > { %v1065_v35 = vrot.slane %v1064_v34, 4 }
 0x47d   : > { %v1066_v36 = vadd.f32 %v1065_v35, %v1064_v34 }
 0x47f   : > { %v1067_v37 = vrot.slane %v1066_v36, 2 }
 0x481   : > { %v1068_v38 = vadd.f32 %v1067_v37, %v1066_v36 }
 0x483   : > { %v1069_v39 = vrot.slane %v1068_v38, 1 }
 0x485   : > { %v1070_v43 = vadd.f32 %v1069_v39, %v1068_v38 }
 0x487   : > { %v1072_v44 = vadd.f32 %v1071_v41, %v1070_v43 }
 0x489   : > { %v1286_v45 = vmul.f32 -1.442695, %v1072_v44 }
 0x48b   : > { %1900 = vpow2.f32 %v1286_v45 }
 0x495   : > { %v1901_v46 = vpop.eup %1900 }
 0x496   : > { %v1076_v47 = vadd.f32 1.0, %v1901_v46 }
 0x498   : > { %1902 = vrcp.f32 %v1076_v47 }
 0x4a2   : > { %v1903_v48 = vpop.eup %1902 }
 0x4a3   : > { %1101 = vrot.lane.b32.xlu1 %v1903_v48, %s2074_s24  ;;  %1080 = vrot.lane.b32.xlu0 %v1903_v48, %s2082_s29  ;;  %s2501_s24 = smov 80  }
 0x4a7   : > { %1116 = vrot.lane.b32.xlu1 %v1903_v48, %s2068_s25  ;;  %1083 = vrot.lane.b32.xlu0 %v1903_v48, %s2080_s21  ;;  %s2503_s25 = smov 96   ;;  %s2504_s21 = smov 112  }
 0x4ab   : > { %1122 = vrot.lane.b32.xlu1 %v1903_v48, %s2069_s22  ;;  %1086 = vrot.lane.b32.xlu0 %v1903_v48, %s2081_s19  ;;  %s1293_s22 = sshll.u32 %s2157_s13, 8  ;;  %s2505_s19 = sshll.u32 %s2317_s23, 4 }
 0x4ac   : > { %s1166_s13 = scalar_lea.sflag [#allocation5], %s2317_s23 }
 0x4af   : > { %1089 = vrot.lane.b32.xlu0 %v1903_v48, %s2496_s28  ;;  %s379_s28 = scalar_lea.vmem [#allocation9], %s2505_s19 }
 0x4b3   : > { %1092 = vrot.lane.b32.xlu0 %v1903_v48, %s2497_s17  ;;  %s1179_s17 = sshll.u32 %s379_s28, 4  ;;  %s2412_s17 = int_to_ptr.vmem [resolvable:$true] %s1179_s17 }
 0x4b7   : > { %1095 = vrot.lane.b32.xlu0 %v1903_v48, %s2498_s18 }
 0x4bb   : > { %1098 = vrot.lane.b32.xlu0 %v1903_v48, %s2499_s16 }
 0x4bf   : > { %1104 = vrot.lane.b32.xlu0 %v1903_v48, %s2500_s14  ;;  %s2408_s14 = scalar_lea.hbm %s2466_s9, %s1293_s22 }
 0x4c3   : > { %1107 = vrot.lane.b32.xlu0 %v1903_v48, %s2501_s24  ;;  %s1990_s24 = scalar_lea.vmem %s2412_s17, 256 }
 0x4c4   : > { %p1991_p11 = scmp.ne.s32.totalorder %s2412_s17, %s1990_s24 }
 0x4c6   : > { %p1992_p2 = pnand %p1991_p11, %p2506_p0 }
 0x4c7   : > { %1110 = vrot.lane.b32.xlu0 %v1903_v48, %s2502_s15  ;;  %s2084_s15 = smov [#allocation9]  }
 0x4c8   : > { %p1993_p3 = pneg %p1992_p2 }
 0x4cb   : > { %1113 = vrot.lane.b32.xlu0 %v1903_v48, %s2503_s25  ;;  %s1994_s25 = sshll.u32 %s2084_s15, 4  ;;  %s1995_s25 = int_to_ptr.vmem [resolvable:$false] %s1994_s25 }
 0x4cc   : > { %p1997_p7 = scmp.lt.s32.totalorder %s2412_s17, %s1995_s25 }
 0x4cf   : > { %1119 = vrot.lane.b32.xlu0 %v1903_v48, %s2504_s21  ;;  %s1996_s21 = scalar_lea.vmem %s1995_s25, 512 }
 0x4d0   : > { %p1998_p9 = scmp.lt.s32.totalorder %s1996_s21, %s1990_s24 }
 0x4d2   : > { %p1999_p12 = por %p1998_p9, %p1997_p7 }
 0x4d4   : > { %p2000_p1 = pnand %p1999_p12, %p1993_p3 }
 0x515   : > { %v1081_v49 = vpop.permute.xlu0 %1080  ;;  %v1102_v63 = vpop.permute.xlu1 %1101 }
 0x516   : > { %v1126_v56 = vsel %vm1125_vm1, %v1903_v48, %v1081_v49 }
 0x519   : > { %v1084_v50 = vpop.permute.xlu0 %1083  ;;  %v1117_v5 = vpop.permute.xlu1 %1116 }
 0x51a   : > { %v1128_v58 = vsel %vm1127_vm2, %v1126_v56, %v1084_v50 }
 0x51d   : > { %v1087_v51 = vpop.permute.xlu0 %1086  ;;  %v1123_v14 = vpop.permute.xlu1 %1122 }
 0x51e   : > { %v1130_v59 = vsel %vm1129_vm3, %v1128_v58, %v1087_v51 }
 0x521   : > { %v1090_v52 = vpop.permute.xlu0 %1089 }
 0x522   : > { %v1132_v60 = vsel %vm1131_vm4, %v1130_v59, %v1090_v52 }
 0x525   : > { %v1093_v53 = vpop.permute.xlu0 %1092 }
 0x526   : > { %v1134_v61 = vsel %vm1133_vm5, %v1132_v60, %v1093_v53 }
 0x529   : > { %v1096_v54 = vpop.permute.xlu0 %1095 }
 0x52a   : > { %v1136_v0 = vsel %vm1135_vm6, %v1134_v61, %v1096_v54 }
 0x52d   : > { %v1099_v55 = vpop.permute.xlu0 %1098 }
 0x52e   : > { %v1138_v1 = vsel %vm1137_vm7, %v1136_v0, %v1099_v55 }
 0x52f   : > { %v1140_v3 = vsel %vm1139_vm8, %v1138_v1, %v1102_v63 }
 0x531   : > { %v1105_v57 = vpop.permute.xlu0 %1104 }
 0x532   : > { %v1142_v4 = vsel %vm1141_vm9, %v1140_v3, %v1105_v57 }
 0x535   : > { %v1108_v62 = vpop.permute.xlu0 %1107 }
 0x536   : > { %v1144_v6 = vsel %vm1143_vm10, %v1142_v4, %v1108_v62 }
 0x539   : > { %v1111_v2 = vpop.permute.xlu0 %1110 }
 0x53a   : > { %v1146_v7 = vsel %vm1145_vm11, %v1144_v6, %v1111_v2 }
 0x53d   : > { %v1114_v8 = vpop.permute.xlu0 %1113 }
 0x53e   : > { %v1148_v9 = vsel %vm1147_vm12, %v1146_v7, %v1114_v8 }
 0x53f   : > { %v1150_v11 = vsel %vm1149_vm13, %v1148_v9, %v1117_v5 }
 0x541   : > { %v1120_v12 = vpop.permute.xlu0 %1119 }
 0x542   : > { %v1152_v16 = vsel %vm1151_vm14, %v1150_v11, %v1120_v12 }
 0x543   : > { %v1154_v17 = vsel %vm1153_vm15, %v1152_v16, %v1123_v14 }
 0x544   : > { %v1158_v18 = vrot.slane %v1154_v17, %v1047_v19 }
 0x546   : > { %v1159_v20 = vmul.f32 %v1158_v18, %v2347_v42  ;;  %v1160_v21 = vmul.f32 %v1158_v18, %v2345_v40 }
 0x548   : > { %v1161_v22 = vadd.f32 %v1159_v20, %v2331_v10  ;;  %v1162_v23 = vadd.f32 %v1160_v21, %v2335_v13 }
 0x54a   : > { %1163 = vst [vmem:[%s379_s28] sm:$0xff] %v1161_v22  ;;  %1164 = vst [vmem:[%s379_s28 + $0x8] sm:$0xff] %v1162_v23 }
 0x54b   : > { %2003 = shalt.err (!%p2000_p1)
}
 0x54c   : > { %s2004_s22 = scalar_lea.hbm %s2408_s14, 256  ;;  %s2008_s18 = scalar_lea.hbm %s2466_s9, 512 }
 0x54d   : > { %p2005_p13 = scmp.ne.s32.totalorder %s2408_s14, %s2004_s22  ;;  %p2009_p4 = scmp.lt.u32.totalorder %s2408_s14, %s2466_s9 }
 0x54e   : > { %p2010_p5 = scmp.lt.u32.totalorder %s2008_s18, %s2004_s22  ;;  %p2012_p11 = scmp.lt.u32.totalorder %s2004_s22, %s2408_s14 }
 0x54f   : > { %p2006_p6 = pnand %p2005_p13, %p2506_p0 }
 0x550   : > { %p2011_p8 = por %p2010_p5, %p2009_p4 }
 0x551   : > { %p2007_p10 = pneg %p2006_p6 }
 0x552   : > { %p2013_p2 = por %p2012_p11, %p2011_p8 }
 0x554   : > { %p2014_p3 = pnand %p2013_p2, %p2007_p10 }
 0x556   : > { %2017 = shalt.err (!%p2014_p3)
}
 0x557   : > { %s2085_s24 = smov 128  }
 0x558   : > { %1822 = dma.vmem_to_hbm [thread:$0]  (%p2506_p0), %s2412_s17, 256, %s2408_s14, %s1166_s13, %s2085_s24, %s2085_s24, %s2082_s29  }
 0x559 PF: > { %s2507_s25 = sld [smem:[#allocation13_spill]]  ;;  %s1194_s21 = sand.u32 1, %s2048_s30  }
 0x55a   : > { %p2509_p9 = scmp.ge.s32.totalorder %s2060_s12, 2  ;;  %s1195_s22 = scalar_lea.sflag [#allocation5], %s1194_s21 }
 0x55f   : > { %p2508_p7 = scmp.ne.s32.totalorder %s2507_s25, 0 }
 0x561   : > { %p1836_p12 = pnand %p2509_p9, %p2508_p7 }
 0x563   : > { %2043 = dma.done.wait (!%p1836_p12), %s1195_s22, 256  }
 0x564   : > { %2045 = vsyncadd (!%p1836_p12), %s1195_s22, 4294967040  ;;  %p23_p1 = scmp.ge.s32.totalorder %s2252_s20, 4   ;;  %s2510_s30 = smov %s2052_s10 }
 0x565   : > { %s2511_s10 = smov %s2056_s11  ;;  %s2512_s11 = smov %s2268_s27 }
 0x566   : > { %s2513_s12 = smov %s2252_s20  ;;  %25 = sbr.rel (!%p23_p1) target bundleno = 6 (0x6), region = 113 }
 0x56d   :  { %1200 = vsyncpa [#allocation4], 1 }
 0x56e   :  { %1202 = vsyncpa [#allocation4 + $0x1], 1 }
 0x56f   :  { %1203 = vsyncpa [#allocation7], 1 }
 0x570   :  { %1204 = vsyncpa [#allocation5], 1 }
 0x571   :  { %1206 = vsyncpa [#allocation5 + $0x1], 1 }

</bundles_post_ra>
